<compile_context>
chip_gen: v5e
topology: v5e:2x2
jax: 0.10.0
libtpu: 0.0.40
codegen_flags: <defaults>
</compile_context>

<pallas_src>
import numpy as np
import jax
import jax.numpy as jnp
from jax.experimental import pallas as pl
from jax.experimental.pallas import tpu as pltpu

# ---- module-consistent config ---------------------------------------------
B = 2                 # batch
S = 16                # "sentences" axis (conv height)
E = 32                # embedding_size
SC = 2                # sentences_count (conv kernel height)
K = 8                 # kernels_count (conv out channels)
PC = 5                # pieces_count
H0, H1 = 16, 16       # hidden_layers
NUM_CLASSES = (3, 4, 5, 3, 4)   # number_of_classes (5 targets)
H = S - SC + 1        # conv output height (15)
PS = H // PC          # pieces_size (3)
NUM_HEADS = len(NUM_CLASSES)
TOTAL = sum(NUM_CLASSES)        # fused head width (19)

# ---- packed weight-slab layout (all row offsets are multiples of 8) --------
OFF_CW = 0                      # Wcat: (E, SC*K)          rows   0..31
OFF_W1 = OFF_CW + E             # w1 (piece-major): (PC*K, H0)  32..71
OFF_W2 = OFF_W1 + PC * K        # w2: (H0, H1)                  72..87
OFF_HW = OFF_W2 + H0            # fused head weights: (H1, TOTAL) 88..103
OFF_M = OFF_HW + H1             # block-diag softmax mask: (TOTAL, TOTAL) 104..122
W_ROWS = 128
W_COLS = 32


def _forward_kernel(x_ref, w_ref, b_ref, out_ref):
    def sigmoid(v):
        # numerically stable sigmoid on the EUP (tanh); no divide, no overflow
        return 0.5 * (jnp.tanh(0.5 * v) + 1.0)

    # --- conv as one matmul + shift-add + bias + ReLU -> (B, H, K)
    x = x_ref[...]                                      # (B, S, E)
    wcat = w_ref[OFF_CW:OFF_CW + E, 0:SC * K]           # (E, SC*K)
    z = jnp.einsum('bse,ek->bsk', x, wcat,
                   preferred_element_type=jnp.float32)  # (B, S, SC*K)
    cb = b_ref[0:1, 0:K]                                # (1, K)
    conv = jnp.maximum(z[:, :H, 0:K] + z[:, 1:, K:SC * K] + cb, 0.0)

    # --- piecewise AdaptiveMaxPool2d((1, None)) over height; reproduces the
    # module's for/else slicing exactly (overlapping tail [(PC-2)*PS:]).
    pooled = [jnp.max(conv[:, p * PS:(p + 1) * PS, :], axis=1)
              for p in range(PC - 1)]
    pooled.append(jnp.max(conv[:, (PC - 2) * PS:, :], axis=1))
    feat = jnp.concatenate(pooled, axis=-1)             # (B, PC*K), piece-major

    # --- fc_layer1 / fc_layer2: Linear -> Sigmoid (dropout = identity, eval)
    w1 = w_ref[OFF_W1:OFF_W1 + PC * K, 0:H0]
    h1 = sigmoid(jnp.dot(feat, w1, preferred_element_type=jnp.float32)
                 + b_ref[1:2, 0:H0])
    w2 = w_ref[OFF_W2:OFF_W2 + H0, 0:H1]
    h2 = sigmoid(jnp.dot(h1, w2, preferred_element_type=jnp.float32)
                 + b_ref[2:3, 0:H1])
    # TODO(synk): forward() calls self.fc_layer3, which is never defined in
    # __init__ (would raise AttributeError in PyTorch); skipped here.

    # --- fused multitarget heads: one Linear -> Sigmoid -> per-head Softmax
    hw = w_ref[OFF_HW:OFF_HW + H1, 0:TOTAL]
    hz = sigmoid(jnp.dot(h2, hw, preferred_element_type=jnp.float32)
                 + b_ref[3:4, 0:TOTAL])                 # (B, TOTAL)
    # sigmoid output is bounded in (0,1): exp cannot overflow, and softmax is
    # shift-invariant, so the max-subtraction is dropped.
    ez = jnp.exp(hz)
    # per-head sums broadcast back over each head block via a block-diagonal
    # mask matmul -> denom[b, j] = sum over the head containing j.
    m = w_ref[OFF_M:OFF_M + TOTAL, 0:TOTAL]
    denom = jnp.dot(ez, m, preferred_element_type=jnp.float32)
    out_ref[...] = ez * pl.reciprocal(denom, approx=True)


def init_params(key):
    ks = jax.random.split(key, 4 + 2 * NUM_HEADS)
    p = {}
    # Conv2d(1, K, [SC, E]) weight flattened to (SC*E, K); row order (r, e).
    p['conv_w'] = 0.1 * jax.random.normal(ks[0], (SC * E, K), jnp.float32)
    p['conv_b'] = 0.1 * jax.random.normal(ks[1], (1, K), jnp.float32)

    # fc_layer1 weight in "torch feature order" (index = k*PC + p); the kernel
    # builds features piece-major (index = p*K + k), so permute the rows.
    w1_torch = 0.1 * jax.random.normal(ks[2], (K * PC, H0), jnp.float32)
    perm = np.arange(K * PC).reshape(K, PC).T.reshape(-1)  # perm[p*K+k] = k*PC+p
    p['w1'] = w1_torch[perm]
    p['b1'] = 0.1 * jax.random.normal(ks[3], (1, H0), jnp.float32)

    p['w2'] = 0.1 * jax.random.normal(ks[4], (H0, H1), jnp.float32)
    p['b2'] = 0.1 * jax.random.normal(ks[5], (1, H1), jnp.float32)

    p['head_w'] = []
    p['head_b'] = []
    for i, nc in enumerate(NUM_CLASSES):
        p['head_w'].append(
            0.1 * jax.random.normal(ks[6 + 2 * i], (H1, nc), jnp.float32))
        p['head_b'].append(
            0.1 * jax.random.normal(ks[7 + 2 * i], (1, nc), jnp.float32))
    return p


def pack_params(p):
    """Pack all parameters into two f32 slabs (weights, biases)."""
    wslab = np.zeros((W_ROWS, W_COLS), np.float32)
    # conv weight split by kernel row r and laid side by side -> (E, SC*K)
    wcat = np.concatenate(
        [np.asarray(p['conv_w'][r * E:(r + 1) * E, :]) for r in range(SC)],
        axis=1)
    wslab[OFF_CW:OFF_CW + E, :SC * K] = wcat
    wslab[OFF_W1:OFF_W1 + PC * K, :H0] = np.asarray(p['w1'])
    wslab[OFF_W2:OFF_W2 + H0, :H1] = np.asarray(p['w2'])
    hw = np.concatenate([np.asarray(w) for w in p['head_w']], axis=1)
    wslab[OFF_HW:OFF_HW + H1, :TOTAL] = hw
    # block-diagonal mask for the fused per-head softmax denominators
    mask = np.zeros((TOTAL, TOTAL), np.float32)
    off = 0
    for nc in NUM_CLASSES:
        mask[off:off + nc, off:off + nc] = 1.0
        off += nc
    wslab[OFF_M:OFF_M + TOTAL, :TOTAL] = mask

    bslab = np.zeros((4, W_COLS), np.float32)
    bslab[0, :K] = np.asarray(p['conv_b'])[0]
    bslab[1, :H0] = np.asarray(p['b1'])[0]
    bslab[2, :H1] = np.asarray(p['b2'])[0]
    bslab[3, :TOTAL] = np.concatenate([np.asarray(b)[0] for b in p['head_b']])
    return jnp.asarray(wslab), jnp.asarray(bslab)


def forward(x_nchw, wslab, bslab):
    # x_nchw: (B, 1, S, E) as PyTorch would get after convert_input().
    x = x_nchw[:, 0, :, :]  # (B, S, E); no im2col, no duplicated HBM data

    vmem_spec = pl.BlockSpec(memory_space=pltpu.MemorySpace.VMEM)
    fn = pl.pallas_call(
        _forward_kernel,
        out_shape=jax.ShapeDtypeStruct((B, TOTAL), jnp.float32),
        in_specs=[vmem_spec, vmem_spec, vmem_spec],
        out_specs=vmem_spec,
    )
    out = fn(x, wslab, bslab)  # single lane-dense (B, TOTAL) output

    # per-head slices (matches the module's list-of-5-softmaxes return)
    outs = []
    off = 0
    for nc in NUM_CLASSES:
        outs.append(out[:, off:off + nc])
        off += nc
    return outs


if __name__ == "__main__":
    key = jax.random.PRNGKey(0)
    kx, kp = jax.random.split(key)
    # PyTorch-side input: (B, 1, S, E) (NCHW with a singleton channel).
    x = jax.random.normal(kx, (B, 1, S, E), jnp.float32)
    params = init_params(kp)
    wslab, bslab = pack_params(params)

    outs = forward(x, wslab, bslab)
    outs = jax.block_until_ready(outs)

    assert len(outs) == NUM_HEADS
    for o, nc in zip(outs, NUM_CLASSES):
        assert o.shape == (B, nc)
        # each head is a softmax -> rows sum to ~1 (approx reciprocal used)
        np.testing.assert_allclose(np.asarray(jnp.sum(o, axis=1)),
                                   np.ones((B,), np.float32),
                                   rtol=0, atol=5e-3)
    print("KERNEL_OK")
</pallas_src>

<mosaic_0001>
module attributes {stable_mosaic.version = 11 : i64} {
  func.func @_forward_kernel(%arg0: memref<2x16x32xf32, #tpu.memory_space<vmem>>, %arg1: memref<128x32xf32, #tpu.memory_space<vmem>>, %arg2: memref<4x32xf32, #tpu.memory_space<vmem>>, %arg3: memref<2x19xf32, #tpu.memory_space<vmem>>) attributes {dimension_semantics = [], scalar_prefetch = 0 : i64, scratch_operands = 0 : i64, tpu.core_type = #tpu.core_type<tc>} {
    %c0 = arith.constant 0 : index
    %c0_0 = arith.constant 0 : index
    %c0_1 = arith.constant 0 : index
    %0 = vector.load %arg0[%c0, %c0_0, %c0_1] : memref<2x16x32xf32, #tpu.memory_space<vmem>>, vector<2x16x32xf32>
    %c0_2 = arith.constant 0 : index
    %c0_3 = arith.constant 0 : index
    %1 = vector.load %arg1[%c0_2, %c0_3] : memref<128x32xf32, #tpu.memory_space<vmem>>, vector<32x16xf32>
    "tpu.trace_start"() <{level = 10 : i32, message = "bse,ek->bsk"}> : () -> ()
    %cst = arith.constant dense<0.000000e+00> : vector<2x16x16xf32>
    %2 = tpu.matmul %0, %1, %cst {dimension_numbers = #tpu.dot_dimension_numbers<[2], [0], [0, 1], [1], [0, 0, 0, 1, 1, 1], [], []>} : vector<2x16x32xf32>, vector<32x16xf32>, vector<2x16x16xf32> -> vector<2x16x16xf32>
    "tpu.trace_stop"() : () -> ()
    %c0_4 = arith.constant 0 : index
    %c0_5 = arith.constant 0 : index
    %3 = vector.load %arg2[%c0_4, %c0_5] : memref<4x32xf32, #tpu.memory_space<vmem>>, vector<1x8xf32>
    %4 = vector.extract_strided_slice %2 {offsets = [0, 0, 0], sizes = [2, 15, 8], strides = [1, 1, 1]} : vector<2x16x16xf32> to vector<2x15x8xf32>
    %5 = vector.extract_strided_slice %2 {offsets = [0, 1, 8], sizes = [2, 15, 8], strides = [1, 1, 1]} : vector<2x16x16xf32> to vector<2x15x8xf32>
    %6 = arith.addf %4, %5 : vector<2x15x8xf32>
    %7 = vector.shape_cast %3 : vector<1x8xf32> to vector<1x1x8xf32>
    %8 = vector.broadcast %7 : vector<1x1x8xf32> to vector<2x15x8xf32>
    %9 = arith.addf %6, %8 : vector<2x15x8xf32>
    %cst_6 = arith.constant 0.000000e+00 : f32
    %10 = vector.broadcast %cst_6 : f32 to vector<2x15x8xf32>
    %11 = arith.maximumf %9, %10 : vector<2x15x8xf32>
    %12 = vector.extract_strided_slice %11 {offsets = [0, 0, 0], sizes = [2, 3, 8], strides = [1, 1, 1]} : vector<2x15x8xf32> to vector<2x3x8xf32>
    %cst_7 = arith.constant dense<0xFF800000> : vector<2x8xf32>
    %13 = vector.multi_reduction <maximumf>, %12, %cst_7 [1] : vector<2x3x8xf32> to vector<2x8xf32>
    %14 = vector.extract_strided_slice %11 {offsets = [0, 3, 0], sizes = [2, 3, 8], strides = [1, 1, 1]} : vector<2x15x8xf32> to vector<2x3x8xf32>
    %cst_8 = arith.constant dense<0xFF800000> : vector<2x8xf32>
    %15 = vector.multi_reduction <maximumf>, %14, %cst_8 [1] : vector<2x3x8xf32> to vector<2x8xf32>
    %16 = vector.extract_strided_slice %11 {offsets = [0, 6, 0], sizes = [2, 3, 8], strides = [1, 1, 1]} : vector<2x15x8xf32> to vector<2x3x8xf32>
    %cst_9 = arith.constant dense<0xFF800000> : vector<2x8xf32>
    %17 = vector.multi_reduction <maximumf>, %16, %cst_9 [1] : vector<2x3x8xf32> to vector<2x8xf32>
    %18 = vector.extract_strided_slice %11 {offsets = [0, 9, 0], sizes = [2, 3, 8], strides = [1, 1, 1]} : vector<2x15x8xf32> to vector<2x3x8xf32>
    %cst_10 = arith.constant dense<0xFF800000> : vector<2x8xf32>
    %19 = vector.multi_reduction <maximumf>, %18, %cst_10 [1] : vector<2x3x8xf32> to vector<2x8xf32>
    %20 = vector.extract_strided_slice %11 {offsets = [0, 9, 0], sizes = [2, 6, 8], strides = [1, 1, 1]} : vector<2x15x8xf32> to vector<2x6x8xf32>
    %cst_11 = arith.constant dense<0xFF800000> : vector<2x8xf32>
    %21 = vector.multi_reduction <maximumf>, %20, %cst_11 [1] : vector<2x6x8xf32> to vector<2x8xf32>
    %22 = tpu.concatenate %13, %15, %17, %19, %21 in 1 : vector<2x8xf32>, vector<2x8xf32>, vector<2x8xf32>, vector<2x8xf32>, vector<2x8xf32> -> vector<2x40xf32>
    %c32 = arith.constant 32 : index
    %c0_12 = arith.constant 0 : index
    %23 = vector.load %arg1[%c32, %c0_12] : memref<128x32xf32, #tpu.memory_space<vmem>>, vector<40x16xf32>
    %cst_13 = arith.constant dense<0.000000e+00> : vector<2x16xf32>
    %24 = tpu.matmul %22, %23, %cst_13 {dimension_numbers = #tpu.dot_dimension_numbers<[1], [0], [0], [1], [0, 0, 1, 1], [], []>} : vector<2x40xf32>, vector<40x16xf32>, vector<2x16xf32> -> vector<2x16xf32>
    %c1 = arith.constant 1 : index
    %c0_14 = arith.constant 0 : index
    %25 = vector.load %arg2[%c1, %c0_14] : memref<4x32xf32, #tpu.memory_space<vmem>>, vector<1x16xf32>
    %26 = vector.broadcast %25 : vector<1x16xf32> to vector<2x16xf32>
    %27 = arith.addf %24, %26 : vector<2x16xf32>
    %cst_15 = arith.constant 5.000000e-01 : f32
    %28 = vector.broadcast %cst_15 : f32 to vector<2x16xf32>
    %29 = arith.mulf %28, %27 : vector<2x16xf32>
    %30 = math.tanh %29 : vector<2x16xf32>
    %cst_16 = arith.constant 1.000000e+00 : f32
    %31 = vector.broadcast %cst_16 : f32 to vector<2x16xf32>
    %32 = arith.addf %30, %31 : vector<2x16xf32>
    %cst_17 = arith.constant 5.000000e-01 : f32
    %33 = vector.broadcast %cst_17 : f32 to vector<2x16xf32>
    %34 = arith.mulf %33, %32 : vector<2x16xf32>
    %c72 = arith.constant 72 : index
    %c0_18 = arith.constant 0 : index
    %35 = vector.load %arg1[%c72, %c0_18] : memref<128x32xf32, #tpu.memory_space<vmem>>, vector<16x16xf32>
    %cst_19 = arith.constant dense<0.000000e+00> : vector<2x16xf32>
    %36 = tpu.matmul %34, %35, %cst_19 {dimension_numbers = #tpu.dot_dimension_numbers<[1], [0], [0], [1], [0, 0, 1, 1], [], []>} : vector<2x16xf32>, vector<16x16xf32>, vector<2x16xf32> -> vector<2x16xf32>
    %c2 = arith.constant 2 : index
    %c0_20 = arith.constant 0 : index
    %37 = vector.load %arg2[%c2, %c0_20] : memref<4x32xf32, #tpu.memory_space<vmem>>, vector<1x16xf32>
    %38 = vector.broadcast %37 : vector<1x16xf32> to vector<2x16xf32>
    %39 = arith.addf %36, %38 : vector<2x16xf32>
    %cst_21 = arith.constant 5.000000e-01 : f32
    %40 = vector.broadcast %cst_21 : f32 to vector<2x16xf32>
    %41 = arith.mulf %40, %39 : vector<2x16xf32>
    %42 = math.tanh %41 : vector<2x16xf32>
    %cst_22 = arith.constant 1.000000e+00 : f32
    %43 = vector.broadcast %cst_22 : f32 to vector<2x16xf32>
    %44 = arith.addf %42, %43 : vector<2x16xf32>
    %cst_23 = arith.constant 5.000000e-01 : f32
    %45 = vector.broadcast %cst_23 : f32 to vector<2x16xf32>
    %46 = arith.mulf %45, %44 : vector<2x16xf32>
    %c88 = arith.constant 88 : index
    %c0_24 = arith.constant 0 : index
    %47 = vector.load %arg1[%c88, %c0_24] : memref<128x32xf32, #tpu.memory_space<vmem>>, vector<16x19xf32>
    %cst_25 = arith.constant dense<0.000000e+00> : vector<2x19xf32>
    %48 = tpu.matmul %46, %47, %cst_25 {dimension_numbers = #tpu.dot_dimension_numbers<[1], [0], [0], [1], [0, 0, 1, 1], [], []>} : vector<2x16xf32>, vector<16x19xf32>, vector<2x19xf32> -> vector<2x19xf32>
    %c3 = arith.constant 3 : index
    %c0_26 = arith.constant 0 : index
    %49 = vector.load %arg2[%c3, %c0_26] : memref<4x32xf32, #tpu.memory_space<vmem>>, vector<1x19xf32>
    %50 = vector.broadcast %49 : vector<1x19xf32> to vector<2x19xf32>
    %51 = arith.addf %48, %50 : vector<2x19xf32>
    %cst_27 = arith.constant 5.000000e-01 : f32
    %52 = vector.broadcast %cst_27 : f32 to vector<2x19xf32>
    %53 = arith.mulf %52, %51 : vector<2x19xf32>
    %54 = math.tanh %53 : vector<2x19xf32>
    %cst_28 = arith.constant 1.000000e+00 : f32
    %55 = vector.broadcast %cst_28 : f32 to vector<2x19xf32>
    %56 = arith.addf %54, %55 : vector<2x19xf32>
    %cst_29 = arith.constant 5.000000e-01 : f32
    %57 = vector.broadcast %cst_29 : f32 to vector<2x19xf32>
    %58 = arith.mulf %57, %56 : vector<2x19xf32>
    %59 = math.exp %58 : vector<2x19xf32>
    %c104 = arith.constant 104 : index
    %c0_30 = arith.constant 0 : index
    %60 = vector.load %arg1[%c104, %c0_30] : memref<128x32xf32, #tpu.memory_space<vmem>>, vector<19x19xf32>
    %cst_31 = arith.constant dense<0.000000e+00> : vector<2x19xf32>
    %61 = tpu.matmul %59, %60, %cst_31 {dimension_numbers = #tpu.dot_dimension_numbers<[1], [0], [0], [1], [0, 0, 1, 1], [], []>} : vector<2x19xf32>, vector<19x19xf32>, vector<2x19xf32> -> vector<2x19xf32>
    %62 = tpu.reciprocal %61 {approx = true} : vector<2x19xf32> -> vector<2x19xf32>
    %63 = arith.mulf %59, %62 : vector<2x19xf32>
    %c0_32 = arith.constant 0 : index
    %c0_33 = arith.constant 0 : index
    %64 = vector.load %arg3[%c0_32, %c0_33] : memref<2x19xf32, #tpu.memory_space<vmem>>, vector<2x19xf32>
    tpu.vector_store %arg3[%c0_32, %c0_33], %63 {strides = array<i32>} : memref<2x19xf32, #tpu.memory_space<vmem>>, vector<2x19xf32>,
    return
  }
}

</mosaic_0001>

<bundles_post_ra>
// kernel: tpu_custom_call.1
= control target key start
LH: loop header
LB: loop body
LE: loop exit
PB: predicated region body
PF: predicated region fallthrough
CT: control target
= control target key end

     0   :  { %s553_s0 = inlined_call_operand.vmem [shape: f32[2,16,32], index: 0, kind: input, shape index: {}]   ;;  %s554_s1 = inlined_call_operand.vmem [shape: f32[128,32], index: 1, kind: input, shape index: {}]   ;;  %s555_s2 = inlined_call_operand.vmem [shape: f32[4,32], index: 2, kind: input, shape index: {}]   ;;  %s556_s3 = inlined_call_operand.hbm [shape: f32[2,19], index: 3, kind: output, shape index: {}]  }
   0x1   :  { %v22_v0 = vld [vmem:[%s554_s1 + $0x18] sm:$0xff]  ;;  %v21_v1 = vld [vmem:[%s554_s1 + $0x10] sm:$0xff]  ;;  %v20_v2 = vld [vmem:[%s554_s1 + $0x8] sm:$0xff] }
   0x2   :  { %48 = vmatpush.msra.mxu0 %v22_v0  ;;  %378 = vmatpush.msra.mxu3 %v22_v0  ;;  %v19_v3 = vld [vmem:[%s554_s1] sm:$0xff] }
   0x3   :  { %377 = vmatpush.msra.mxu1 %v22_v0 }
   0x4   :  { %49 = vmatpush.msra.mxu0 %v21_v1  ;;  %380 = vmatpush.msra.mxu3 %v21_v1 }
   0x5   :  { %379 = vmatpush.msra.mxu1 %v21_v1 }
   0x6   :  { %8 = vsyncpa [#allocation3], 0  ;;  %50 = vmatpush.msra.mxu0 %v20_v2  ;;  %382 = vmatpush.msra.mxu3 %v20_v2  ;;  %v15_v4 = vld [vmem:[%s553_s0] sm:$0xff]  ;;  %vm23_vm0 = vcmask 261120   ;;  %v18_v5 = vld [vmem:[%s553_s0 + $0x18] sm:$0xff]  ;;  %vm70_vm1 = vcmask 1046528  }
   0x7   :  { %381 = vmatpush.msra.mxu1 %v20_v2  ;;  %v17_v6 = vld [vmem:[%s553_s0 + $0x10] sm:$0xff]  ;;  %v16_v7 = vld [vmem:[%s553_s0 + $0x8] sm:$0xff]  ;;  %s431_s28 = smov 120   ;;  %v391_v18 = vld [vmem:[%s555_s2] ss:$0 sm:$0xff]  ;;  %vm102_vm2 = vcmask 59392  }
   0x8   :  { %51 = vmatpush.msra.mxu0 %v19_v3  ;;  %384 = vmatpush.msra.mxu3 %v19_v3  ;;  %vm117_vm3 = vcmask 62467   ;;  %vm132_vm4 = vcmask 64518   ;;  %vm134_vm5 = vcmask 57344   ;;  %vm152_vm6 = vcmask 60417   ;;  %s432_s30 = smov 8   ;;  %s433_s4 = smov 32  }
   0x9   :  { %368 = vmatmul.msk.f32.vlgmr.msra.gmra.mxu0 %vm23_vm0, %v15_v4  ;;  %371 = vmatmul.msk.f32.vlgmr.msra.gmra.mxu3 %vm23_vm0, %v18_v5  ;;  %vm167_vm7 = vcmask 63489   ;;  %vm184_vm8 = vcmask 1041409   ;;  %s434_s5 = smov 24   ;;  %s435_s6 = smov 16   ;;  %vm211_vm9 = vcmask 64512   ;;  %vm213_vm10 = vcmask 130048  }
   0xa   :  { %383 = vmatpush.msra.mxu1 %v19_v3  ;;  %vm215_vm11 = vcmask 195584   ;;  %vm225_vm12 = vcmask 326656   ;;  %vm324_vm13 = vcmask 1042432   ;;  %vm320_vm14 = vcmask 154624  }
   0xb   :  { %370 = vmatmul.msk.f32.vlgmr.msra.gmra.mxu1 %vm23_vm0, %v17_v6  ;;  %vm350_vm15 = vcmask 148480  }
  0x11   :  { %369 = vmatmul.msk.f32.gmra.mxu0 %vm23_vm0, %v16_v7 }
  0x86   :  { %v53_v8 = vpop.f32.mrf.mxu0 }
  0x87   :  { %v71_v14 = vrot.slane %v53_v8, 1 }
  0x88   :  { %v59_v9 = vpop.f32.mrf.mxu1 }
  0x89   :  { %v74_v10 = vrot.slane %v59_v9, 1 }
  0x8c   :  { %v62_v11 = vpop.f32.mrf.mxu3 }
  0x8d   :  { %v75_v12 = vrot.slane %v62_v11, 1 }
  0x8e   :  { %v56_v13 = vpop.f32.mrf.mxu0 }
  0x8f   :  { %v72_v15 = vrot.slane %v56_v13, 1  ;;  %v76_v16 = vsel %vm70_vm1, %v74_v10, %v75_v12 }
  0x90   :  { %81 = vrot.lane.b32.xlu1 %v76_v16, %s431_s28 }
  0x91   :  { %v73_v17 = vsel %vm70_vm1, %v71_v14, %v72_v15 }
  0x92   :  { %77 = vrot.lane.b32.xlu0 %v73_v17, %s431_s28 }
  0x98   :  { %83 = vrot.lane.b32.xlu1 %v75_v12, %s431_s28 }
  0x9a   :  { %79 = vrot.lane.b32.xlu0 %v72_v15, %s431_s28 }
 0x102   :  { %v82_v19 = vpop.permute.xlu1 %81 }
 0x103   :  { %v91_v20 = vadd.f32 %v82_v19, %v59_v9 }
 0x104   :  { %v78_v21 = vpop.permute.xlu0 %77 }
 0x105   :  { %v96_v22 = vadd.f32 %v391_v18, %v91_v20  ;;  %v89_v23 = vadd.f32 %v78_v21, %v53_v8 }
 0x107   :  { %v100_v24 = vmax.f32 %v96_v22, 0.0  ;;  %v94_v25 = vadd.f32 %v391_v18, %v89_v23 }
 0x109   :  { %v110_v26 = vsel %vm102_vm2, %v100_v24, -inf  ;;  %v125_v27 = vsel %vm117_vm3, %v100_v24, -inf  ;;  %v98_v28 = vmax.f32 %v94_v25, 0.0  ;;  %v143_v45 = vsel %vm132_vm4, %v100_v24, -inf }
 0x10a   :  { %v111_v29 = vrot.slane %v110_v26, 4  ;;  %v126_v30 = vrot.slane %v125_v27, 4  ;;  %v84_v31 = vpop.permute.xlu1 %83 }
 0x10b   :  { %v103_v32 = vsel %vm102_vm2, %v98_v28, -inf  ;;  %v118_v33 = vsel %vm117_vm3, %v98_v28, -inf  ;;  %v92_v34 = vadd.f32 %v84_v31, %v62_v11  ;;  %v133_v46 = vsel %vm132_vm4, %v98_v28, -inf }
 0x10c   :  { %v112_v35 = vmax.f32 %v110_v26, %v111_v29  ;;  %v127_v36 = vmax.f32 %v125_v27, %v126_v30  ;;  %v104_v37 = vrot.slane %v103_v32, 4  ;;  %v119_v38 = vrot.slane %v118_v33, 4  ;;  %v80_v39 = vpop.permute.xlu0 %79 }
 0x10d   :  { %v97_v40 = vadd.f32 %v391_v18, %v92_v34  ;;  %v90_v41 = vadd.f32 %v80_v39, %v56_v13 }
 0x10e   :  { %v105_v42 = vmax.f32 %v103_v32, %v104_v37  ;;  %v120_v43 = vmax.f32 %v118_v33, %v119_v38  ;;  %v128_v44 = vrot.slane %v127_v36, 2  ;;  %v113_v49 = vrot.slane %v112_v35, 2 }
 0x10f   :  { %v101_v47 = vmax.f32 %v97_v40, 0.0  ;;  %v95_v48 = vadd.f32 %v391_v18, %v90_v41 }
 0x110   :  { %v106_v50 = vrot.slane %v105_v42, 2  ;;  %v121_v51 = vrot.slane %v120_v43, 2  ;;  %v129_v52 = vmax.f32 %v127_v36, %v128_v44  ;;  %v114_v8 = vmax.f32 %v112_v35, %v113_v49 }
 0x111   :  { %v144_v53 = vsel %vm134_vm5, %v101_v47, -inf  ;;  %v160_v54 = vsel %vm152_vm6, %v101_v47, -inf  ;;  %v175_v55 = vsel %vm167_vm7, %v101_v47, -inf  ;;  %v99_v56 = vmax.f32 %v95_v48, 0.0 }
 0x112   :  { %v145_v57 = vmax.f32 %v143_v45, %v144_v53  ;;  %v161_v58 = vrot.slane %v160_v54, 4  ;;  %v176_v59 = vrot.slane %v175_v55, 4  ;;  %v122_v60 = vmax.f32 %v120_v43, %v121_v51  ;;  %v221_v51 = vld [vmem:[%s554_s1 + $0x38] sm:$0xff]  ;;  %v219_v53 = vld [vmem:[%s554_s1 + $0x28] sm:$0xff] }
 0x113   :  { %v135_v61 = vsel %vm134_vm5, %v99_v56, -inf  ;;  %v153_v62 = vsel %vm152_vm6, %v99_v56, -inf  ;;  %v168_v63 = vsel %vm167_vm7, %v99_v56, -inf  ;;  %v130_v0 = vrot.slane %v129_v52, 1 }
 0x114   :  { %v146_v1 = vrot.slane %v145_v57, 4  ;;  %v162_v2 = vmax.f32 %v160_v54, %v161_v58  ;;  %v177_v3 = vmax.f32 %v175_v55, %v176_v59  ;;  %v136_v4 = vmax.f32 %v133_v46, %v135_v61  ;;  %v218_v54 = vld [vmem:[%s554_s1 + $0x20] sm:$0xff] }
 0x115   :  { %v154_v5 = vrot.slane %v153_v62, 4  ;;  %v169_v6 = vrot.slane %v168_v63, 4  ;;  %v123_v7 = vrot.slane %v122_v60, 1  ;;  %v131_v16 = vmax.f32 %v129_v52, %v130_v0  ;;  %v220_v52 = vld [vmem:[%s554_s1 + $0x30] sm:$0xff]  ;;  %v253_v0 = vld [vmem:[%s554_s1 + $0x48] sm:$0xff] }
 0x116   :  { %v137_v9 = vrot.slane %v136_v4, 4  ;;  %v178_v10 = vrot.slane %v177_v3, 2  ;;  %v163_v11 = vrot.slane %v162_v2, 2  ;;  %v147_v12 = vmax.f32 %v145_v57, %v146_v1  ;;  %v392_v1 = vld [vmem:[%s555_s2 + $0x1] ss:$0 sm:$0xff] }
 0x117   :  { %v155_v13 = vmax.f32 %v153_v62, %v154_v5  ;;  %v170_v14 = vmax.f32 %v168_v63, %v169_v6  ;;  %v124_v15 = vmax.f32 %v122_v60, %v123_v7  ;;  %v115_v27 = vrot.slane %v114_v8, 1  ;;  %v254_v63 = vld [vmem:[%s554_s1 + $0x50] sm:$0xff] }
 0x118   :  { %v179_v17 = vmax.f32 %v177_v3, %v178_v10  ;;  %v164_v18 = vmax.f32 %v162_v2, %v163_v11  ;;  %v138_v19 = vmax.f32 %v136_v4, %v137_v9  ;;  %v148_v20 = vrot.slane %v147_v12, 2  ;;  %274 = vmatpush.msra.mxu2 %v254_v63  ;;  %v284_v9 = vld [vmem:[%s554_s1 + $0x58] sm:$0xff]  ;;  %v393_v10 = vld [vmem:[%s555_s2 + $0x2] ss:$0 sm:$0xff] }
 0x119   :  { %v189_v21 = vsel %vm184_vm8, %v131_v16, %v124_v15  ;;  %v171_v22 = vrot.slane %v170_v14, 2  ;;  %v156_v23 = vrot.slane %v155_v13, 2  ;;  %v107_v31 = vmax.f32 %v105_v42, %v106_v50  ;;  %v222_v50 = vld [vmem:[%s554_s1 + $0x40] sm:$0xff] }
 0x11a   :  { %190 = vrot.lane.b32.xlu2 %v189_v21, %s432_s30  ;;  %v180_v24 = vrot.slane %v179_v17, 1  ;;  %v139_v25 = vrot.slane %v138_v19, 2  ;;  %v149_v26 = vmax.f32 %v147_v12, %v148_v20  ;;  %v165_v30 = vrot.slane %v164_v18, 1  ;;  %240 = vmatpush.msrb.mxu1 %v222_v50  ;;  %v394_v20 = vld [vmem:[%s555_s2 + $0x3] ss:$0 sm:$0xff]  ;;  %s359_s2 = sshll.u32 %s556_s3, 4  ;;  %s360_s2 = int_to_ptr.hbm [resolvable:$true] %s359_s2 }
 0x11b   :  { %v172_v28 = vmax.f32 %v170_v14, %v171_v22  ;;  %v157_v29 = vmax.f32 %v155_v13, %v156_v23  ;;  %v108_v36 = vrot.slane %v107_v31, 1  ;;  %v116_v39 = vmax.f32 %v114_v8, %v115_v27  ;;  %275 = vmatpush.msra.mxu2 %v253_v0  ;;  %v285_v8 = vld [vmem:[%s554_s1 + $0x60] sm:$0xff] }
 0x11c   :  { %v140_v32 = vmax.f32 %v138_v19, %v139_v25  ;;  %v150_v33 = vrot.slane %v149_v26, 1  ;;  %v181_v37 = vmax.f32 %v179_v17, %v180_v24  ;;  %v166_v43 = vmax.f32 %v164_v18, %v165_v30  ;;  %241 = vmatpush.msrb.mxu1 %v221_v51  ;;  %305 = vmatpush.msrb.mxu3 %v285_v8  ;;  %v319_v17 = vld [vmem:[%s554_s1 + $0x78] sm:$0x7]  ;;  %v318_v18 = vld [vmem:[%s554_s1 + $0x70] sm:$0xff]  ;;  %v317_v19 = vld [vmem:[%s554_s1 + $0x68] sm:$0xff]  ;;  %s436_s1 = smov [#allocation2]  }
 0x11d   :  { %v173_v34 = vrot.slane %v172_v28, 1  ;;  %v158_v35 = vrot.slane %v157_v29, 1  ;;  %v109_v44 = vmax.f32 %v107_v31, %v108_v36  ;;  %375 = vmatpush.msk.msrb.mxu2 %vm324_vm13, %v319_v17  ;;  %s357_s9 = sshll.u32 %s436_s1, 4  ;;  %s358_s9 = int_to_ptr.vmem [resolvable:$true] %s357_s9 }
 0x11e   :  { %v141_v38 = vrot.slane %v140_v32, 1  ;;  %v151_v46 = vmax.f32 %v149_v26, %v150_v33  ;;  %242 = vmatpush.msrb.mxu1 %v220_v52  ;;  %306 = vmatpush.msrb.mxu3 %v284_v9 }
 0x11f   :  { %v174_v40 = vmax.f32 %v172_v28, %v173_v34  ;;  %v159_v41 = vmax.f32 %v157_v29, %v158_v35  ;;  %v185_v42 = vsel %vm184_vm8, %v116_v39, %v109_v44  ;;  %342 = vmatpush.msrb.mxu2 %v318_v18 }
 0x120   :  { %v142_v45 = vmax.f32 %v140_v32, %v141_v38  ;;  %243 = vmatpush.msrb.mxu1 %v219_v53 }
 0x121   :  { %v207_v47 = vsel %vm184_vm8, %v181_v37, %v174_v40  ;;  %v201_v48 = vsel %vm184_vm8, %v166_v43, %v159_v41  ;;  %343 = vmatpush.msrb.mxu2 %v317_v19 }
 0x122   :  { %208 = vrot.lane.b32.xlu1 %v207_v47, %s433_s4  ;;  %202 = vrot.lane.b32.xlu0 %v201_v48, %s434_s5  ;;  %v195_v49 = vsel %vm184_vm8, %v151_v46, %v142_v45 }
 0x123   :  { %196 = vrot.lane.b32.xlu2 %v195_v49, %s435_s6  ;;  %244 = vmatpush.msrb.mxu1 %v218_v54 }
 0x174   :  { %v191_v55 = vpop.permute.xlu2 %190 }
 0x175   :  { %v212_v57 = vsel %vm211_vm9, %v185_v42, %v191_v55 }
 0x17d   :  { %v197_v56 = vpop.permute.xlu2 %196 }
 0x17e   :  { %v214_v58 = vsel %vm213_vm10, %v212_v57, %v197_v56 }
 0x194   :  { %v209_v59 = vpop.permute.xlu1 %208  ;;  %v203_v60 = vpop.permute.xlu0 %202 }
 0x195   :  { %v216_v61 = vsel %vm215_vm11, %v214_v58, %v203_v60 }
 0x196   :  { %v217_v62 = vsel %vm23_vm0, %v216_v61, %v209_v59 }
 0x197   :  { %372 = vmatmul.msk.f32.vlgmr.msrb.gmra.mxu1 %vm225_vm12, %v217_v62 }
 0x214   :  { %v246_v2 = vpop.f32.mrf.mxu1 }
 0x215   :  { %v247_v3 = vadd.f32 %v392_v1, %v246_v2 }
 0x217   :  { %v249_v4 = vmul.f32 0.5, %v247_v3 }
 0x219   :  { %395 = vtanh.f32 %v249_v4 }
 0x21f   :  { %v396_v5 = vpop.eup %395 }
 0x220   :  { %v251_v6 = vadd.f32 1.0, %v396_v5 }
 0x222   :  { %v252_v7 = vmul.f32 0.5, %v251_v6 }
 0x224   :  { %373 = vmatmul.msk.f32.vlgmr.msra.gmra.mxu2 %vm213_vm10, %v252_v7 }
 0x2a7   :  { %v277_v11 = vpop.f32.mrf.mxu2 }
 0x2a8   :  { %v278_v12 = vadd.f32 %v393_v10, %v277_v11 }
 0x2aa   :  { %v280_v13 = vmul.f32 0.5, %v278_v12 }
 0x2ac   :  { %397 = vtanh.f32 %v280_v13 }
 0x2b2   :  { %v398_v14 = vpop.eup %397 }
 0x2b3   :  { %v282_v15 = vadd.f32 1.0, %v398_v14 }
 0x2b5   :  { %v283_v16 = vmul.f32 0.5, %v282_v15 }
 0x2b7   :  { %374 = vmatmul.msk.f32.vlgmr.msrb.gmra.mxu3 %vm213_vm10, %v283_v16 }
 0x33a   :  { %v308_v21 = vpop.f32.mrf.mxu3 }
 0x33b   :  { %v309_v22 = vadd.f32 %v394_v20, %v308_v21 }
 0x33d   :  { %v311_v23 = vmul.f32 0.5, %v309_v22 }
 0x33f   :  { %399 = vtanh.f32 %v311_v23 }
 0x345   :  { %v400_v24 = vpop.eup %399 }
 0x346   :  { %v313_v25 = vadd.f32 1.0, %v400_v24 }
 0x348   :  { %v314_v26 = vmul.f32 0.5, %v313_v25 }
 0x34a   :  { %v315_v27 = vmul.f32 1.442695, %v314_v26 }
 0x34c   :  { %401 = vpow2.f32 %v315_v27 }
 0x352   :  { %v402_v28 = vpop.eup %401 }
 0x353   :  { %376 = vmatmul.msk.f32.vlgmr.msrb.gmra.mxu2 %vm320_vm14, %v402_v28 }
 0x3d6   :  { %v345_v29 = vpop.f32.mrf.mxu2 }
 0x3d7   :  { %403 = vrcp.f32 %v345_v29 }
 0x3dd   :  { %v404_v30 = vpop.eup %403 }
 0x3de   :  { %v349_v31 = vmul.f32 %v404_v30, %v402_v28 }
 0x3e0   :  { %351 = vst.msk [vmem:[#allocation2] sm:$0x3] %vm350_vm15, %v349_v31 }
 0x3e1   :  { %362 = dma.vmem_to_hbm [thread:$0]  %s358_s9, 32, %s360_s2, [#allocation3]  }
 0x3e2   :  { %429 = dma.done.wait [#allocation3], 32  }
 0x3e3   :  { %430 = vsyncadd [#allocation3], 4294967264 }
 0x3e4   :  { %367 = vsyncpa [#allocation3], 1 }

</bundles_post_ra>
